<compile_context>
chip_gen: v5e
topology: v5e:2x2
jax: 0.10.0
libtpu: 0.0.40
codegen_flags: <defaults>
</compile_context>

<pallas_src>
import jax
import jax.numpy as jnp
from jax.experimental import pallas as pl
from jax.experimental.pallas import tpu as pltpu


def _round_up(x, m):
    return (x + m - 1) // m * m


def _cdiv(a, b):
    return -(-a // b)


def _vmem_capacity_bytes():
    """Physical VMEM per core (best effort); conservative v7x-class fallback."""
    try:
        info = pltpu.get_tpu_info()
        cap = getattr(info, "vmem_capacity_bytes", None)
        if cap:
            return int(cap)
    except Exception:
        pass
    return 64 * 1024 * 1024


def _balanced_tile(dim, tile_max, align):
    """Largest align-multiple tile <= tile_max that splits round_up(dim, align)
    into equal-ish tiles (minimizes padding vs. blindly rounding up to tile_max)."""
    dim_a = _round_up(dim, align)
    tile_max = max(align, _round_up(min(tile_max, dim_a), align))
    n_tiles = _cdiv(dim_a, tile_max)
    return _round_up(_cdiv(dim_a, n_tiles), align)


def _bl_kernel_acc_in_out(x_ref, w_ref, b_ref, o_ref):
    """f32 output: accumulate directly into the K-resident output block."""
    k = pl.program_id(3)

    @pl.when(k == 0)
    def _init():
        # Fold the bias into the init (applied exactly once per (b,i,j) tile).
        o_ref[...] = jnp.broadcast_to(b_ref[...].astype(o_ref.dtype), o_ref.shape)

    o_ref[...] += jnp.dot(x_ref[...], w_ref[...],
                          preferred_element_type=jnp.float32)


def _bl_kernel_scratch_acc(x_ref, w_ref, b_ref, o_ref, acc_ref):
    """Low-precision output: f32 scratch accumulator, cast+store on last K step."""
    k = pl.program_id(3)

    @pl.when(k == 0)
    def _init():
        acc_ref[...] = jnp.broadcast_to(b_ref[...].astype(jnp.float32), acc_ref.shape)

    acc_ref[...] += jnp.dot(x_ref[...], w_ref[...],
                            preferred_element_type=jnp.float32)

    @pl.when(k == pl.num_programs(3) - 1)
    def _fin():
        o_ref[...] = acc_ref[...].astype(o_ref.dtype)


def batched_linear(x, weight, bias, *, tm=None, tn=None, tk=None, compute_dtype=None):
    """out[b] = x[b] @ weight[b] + bias[b]   (B, M, K) x (B, K, N) -> (B, M, N)."""
    B, M, K = x.shape
    Bw, Kw, N = weight.shape
    assert (Bw, Kw) == (B, K), "weight shape mismatch"
    assert bias.shape == (B, N), "bias shape mismatch"

    out_dtype = x.dtype
    if compute_dtype is not None:
        x = x.astype(compute_dtype)
        weight = weight.astype(compute_dtype)
    in_bytes = x.dtype.itemsize
    out_bytes = out_dtype.itemsize

    # Sublane alignment for the 2nd-to-last dim of x/out tiles: 8 for 32-bit,
    # 16 for bf16, 32 for 8-bit inputs.
    sub = max(8, 32 // max(1, in_bytes))

    # ---- generation-aware defaults -------------------------------------
    vmem_cap = _vmem_capacity_bytes()
    big_vmem = vmem_cap >= 100 * 1024 * 1024          # v5e / v6e (128 MiB)
    if big_vmem:
        tm_d, tn_d, tk_d = 512, 1024, 2048
        vmem_limit = 96 * 1024 * 1024
    else:                                             # v7x-class (64 MiB)
        tm_d, tn_d, tk_d = 256, 1024, 1024
        vmem_limit = 56 * 1024 * 1024
    tm = tm_d if tm is None else tm
    tn = tn_d if tn is None else tn
    tk = tk_d if tk is None else tk

    # ---- balanced tile selection (minimal padding) ----------------------
    tm = _balanced_tile(M, tm, sub)
    tn = _balanced_tile(N, tn, 128)
    tk = _balanced_tile(K, tk, 128)

    # Small-M GEMMs are HBM-bound on the weight stream (worst on v6e): use a
    # 3-deep weight pipeline when K is long enough and VMEM allows it.
    k_steps = _cdiv(_round_up(K, 128), tk)
    w_bufs = 3 if (big_vmem and M <= 256 and k_steps >= 3) else 2

    # ---- make sure the tiles actually fit under the VMEM limit ---------
    def vmem_est(tm_, tn_, tk_, wb):
        return (2 * tm_ * tk_ * in_bytes                           # x   (x2 buf)
                + wb * tk_ * tn_ * in_bytes                        # w
                + 2 * tn_ * 4                                      # bias
                + 2 * tm_ * tn_ * out_bytes                        # out (x2 buf)
                + (0 if out_dtype == jnp.float32 else tm_ * tn_ * 4))  # acc scratch

    budget = int(vmem_limit * 0.8)
    for _ in range(64):
        if vmem_est(tm, tn, tk, w_bufs) <= budget:
            break
        if w_bufs == 3:
            w_bufs = 2
        elif tk > 128 and tk >= max(tn, tm):
            tk = _balanced_tile(K, tk // 2, 128)
        elif tn > 128 and tn >= tm:
            tn = _balanced_tile(N, tn // 2, 128)
        elif tm > sub:
            tm = _balanced_tile(M, tm // 2, sub)
        elif tk > 128:
            tk = _balanced_tile(K, tk // 2, 128)
        elif tn > 128:
            tn = _balanced_tile(N, tn // 2, 128)
        else:
            break

    # ---- v7x megacore: guarantee >=2 independent (b,i,j) blocks ---------
    if not big_vmem:  # 2-TensorCore generation
        n_parallel = B * _cdiv(_round_up(M, sub), tm) * _cdiv(_round_up(N, 128), tn)
        if n_parallel < 2:
            if _round_up(N, 128) >= 256:
                tn = _round_up(_cdiv(_round_up(N, 128), 2), 128)
            elif _round_up(M, sub) >= 2 * sub:
                tm = _round_up(_cdiv(_round_up(M, sub), 2), sub)

    # ---- pad to tile multiples (padded K cols are zero -> exact) --------
    Mp = _cdiv(M, tm) * tm
    Kp = _cdiv(K, tk) * tk
    Np = _cdiv(N, tn) * tn

    if (Mp, Kp) != (M, K):
        x = jnp.pad(x, ((0, 0), (0, Mp - M), (0, Kp - K)))
    if (Kp, Np) != (K, N):
        weight = jnp.pad(weight, ((0, 0), (0, Kp - K), (0, Np - N)))
    if Np != N:
        bias = jnp.pad(bias, ((0, 0), (0, Np - N)))
    bias3 = bias.reshape(B, 1, Np)

    grid = (B, Mp // tm, Np // tn, Kp // tk)

    if w_bufs == 3:
        w_spec = pl.BlockSpec((None, tk, tn), lambda b, i, j, k: (b, k, j),
                              pipeline_mode=pl.Buffered(3))
    else:
        w_spec = pl.BlockSpec((None, tk, tn), lambda b, i, j, k: (b, k, j))

    acc_in_out = out_dtype == jnp.float32
    kernel = _bl_kernel_acc_in_out if acc_in_out else _bl_kernel_scratch_acc
    scratch = [] if acc_in_out else [pltpu.VMEM((tm, tn), jnp.float32)]

    cost = pl.CostEstimate(
        flops=2 * B * M * K * N,
        transcendentals=0,
        bytes_accessed=(B * M * K * in_bytes + B * K * N * in_bytes
                        + B * N * bias.dtype.itemsize + B * M * N * out_bytes),
    )

    out = pl.pallas_call(
        kernel,
        out_shape=jax.ShapeDtypeStruct((B, Mp, Np), out_dtype),
        grid_spec=pltpu.PrefetchScalarGridSpec(
            num_scalar_prefetch=0,
            grid=grid,
            in_specs=[
                # Leading batch dim squeezed -> kernel sees clean 2-D tiles.
                pl.BlockSpec((None, tm, tk), lambda b, i, j, k: (b, i, k)),
                w_spec,
                pl.BlockSpec((None, 1, tn), lambda b, i, j, k: (b, 0, j)),
            ],
            out_specs=pl.BlockSpec((None, tm, tn), lambda b, i, j, k: (b, i, j)),
            scratch_shapes=scratch,
        ),
        compiler_params=pltpu.CompilerParams(
            # B / M / N independent (megacore-shardable); K reduction last.
            dimension_semantics=("parallel", "parallel", "parallel", "arbitrary"),
            vmem_limit_bytes=vmem_limit,
        ),
        cost_estimate=cost,
    )(x, weight, bias3)

    if (Mp, Np) != (M, N):
        out = out[:, :M, :N]
    return out


if __name__ == "__main__":
    key = jax.random.PRNGKey(0)
    kx, kw, kb = jax.random.split(key, 3)

    # Small shapes consistent with the module: batch=2, seq=8, in=out=32.
    B, M, K, N = 2, 8, 32, 32
    x = jax.random.uniform(kx, (B, M, K), dtype=jnp.float32)
    weight = jax.random.uniform(kw, (B, K, N), dtype=jnp.float32)
    bias = jax.random.uniform(kb, (B, N), dtype=jnp.float32)

    out = jax.block_until_ready(batched_linear(x, weight, bias))
    ref = jnp.einsum("bmk,bkn->bmn", x, weight) + bias[:, None, :]
    assert out.shape == (B, M, N)
    assert jnp.allclose(out, ref, atol=1e-5, rtol=1e-5)

    # Second (still small) check that exercises real tiling: multiple M/N/K tiles,
    # non-tile-multiple sizes, bias applied exactly once, f32 accumulate-in-output.
    B2, M2, K2, N2 = 2, 40, 200, 160
    k2x, k2w, k2b = jax.random.split(jax.random.PRNGKey(1), 3)
    x2 = jax.random.uniform(k2x, (B2, M2, K2), dtype=jnp.float32)
    w2 = jax.random.uniform(k2w, (B2, K2, N2), dtype=jnp.float32)
    b2 = jax.random.uniform(k2b, (B2, N2), dtype=jnp.float32)

    out2 = jax.block_until_ready(batched_linear(x2, w2, b2, tm=16, tn=128, tk=128))
    ref2 = jnp.einsum("bmk,bkn->bmn", x2, w2) + b2[:, None, :]
    assert out2.shape == (B2, M2, N2)
    assert jnp.allclose(out2, ref2, atol=1e-4, rtol=1e-5)

    # Third check: bf16 compute path (bf16 MXU rates, f32 accumulation/output).
    out3 = jax.block_until_ready(
        batched_linear(x, weight, bias, compute_dtype=jnp.bfloat16))
    assert out3.shape == (B, M, N)
    assert jnp.allclose(out3, ref, atol=1e-1, rtol=2e-2)

    print("KERNEL_OK")
</pallas_src>

<mosaic_0001>
module attributes {stable_mosaic.version = 11 : i64} {
  func.func @_bl_kernel_acc_in_out(%arg0: i32, %arg1: i32, %arg2: i32, %arg3: i32, %arg4: memref<1x8x128xf32, #tpu.memory_space<vmem>>, %arg5: memref<1x128x128xf32, #tpu.memory_space<vmem>>, %arg6: memref<1x1x128xf32, #tpu.memory_space<vmem>>, %arg7: memref<1x8x128xf32, #tpu.memory_space<vmem>>) attributes {dimension_semantics = [#tpu.dimension_semantics<parallel>, #tpu.dimension_semantics<parallel>, #tpu.dimension_semantics<parallel>, #tpu.dimension_semantics<arbitrary>], iteration_bounds = array<i64: 2, 1, 1, 1>, scalar_prefetch = 0 : i64, scratch_operands = 0 : i64, tpu.core_type = #tpu.core_type<tc>, window_params = [{transform_indices = @transform_0, window_bounds = array<i64: 1, 8, 128>}, {transform_indices = @transform_1, window_bounds = array<i64: 1, 128, 128>}, {transform_indices = @transform_2, window_bounds = array<i64: 1, 1, 128>}, {transform_indices = @transform_3, window_bounds = array<i64: 1, 8, 128>}]} {
    %c0_i32 = arith.constant 0 : i32
    %0 = arith.cmpi eq, %arg3, %c0_i32 : i32
    %1 = arith.extui %0 : i1 to i32
    %c0_i32_0 = arith.constant 0 : i32
    %2 = arith.cmpi ne, %1, %c0_i32_0 : i32
    scf.if %2 {
      %c0_12 = arith.constant 0 : index
      %c0_13 = arith.constant 0 : index
      %c0_14 = arith.constant 0 : index
      %14 = vector.load %arg6[%c0_12, %c0_13, %c0_14] : memref<1x1x128xf32, #tpu.memory_space<vmem>>, vector<1x1x128xf32>
      %15 = vector.shape_cast %14 : vector<1x1x128xf32> to vector<1x128xf32>
      %16 = vector.shape_cast %15 : vector<1x128xf32> to vector<1x128xf32>
      %17 = vector.broadcast %16 : vector<1x128xf32> to vector<8x128xf32>
      %c0_15 = arith.constant 0 : index
      %c0_16 = arith.constant 0 : index
      %c0_17 = arith.constant 0 : index
      %18 = vector.load %arg7[%c0_15, %c0_16, %c0_17] : memref<1x8x128xf32, #tpu.memory_space<vmem>>, vector<1x8x128xf32>
      %19 = vector.shape_cast %18 : vector<1x8x128xf32> to vector<8x128xf32>
      %20 = vector.shape_cast %17 : vector<8x128xf32> to vector<1x8x128xf32>
      tpu.vector_store %arg7[%c0_15, %c0_16, %c0_17], %20 {strides = array<i32>} : memref<1x8x128xf32, #tpu.memory_space<vmem>>, vector<1x8x128xf32>,
    } else {
    }
    %c0 = arith.constant 0 : index
    %c0_1 = arith.constant 0 : index
    %c0_2 = arith.constant 0 : index
    %3 = vector.load %arg7[%c0, %c0_1, %c0_2] : memref<1x8x128xf32, #tpu.memory_space<vmem>>, vector<1x8x128xf32>
    %4 = vector.shape_cast %3 : vector<1x8x128xf32> to vector<8x128xf32>
    %c0_3 = arith.constant 0 : index
    %c0_4 = arith.constant 0 : index
    %c0_5 = arith.constant 0 : index
    %5 = vector.load %arg4[%c0_3, %c0_4, %c0_5] : memref<1x8x128xf32, #tpu.memory_space<vmem>>, vector<1x8x128xf32>
    %6 = vector.shape_cast %5 : vector<1x8x128xf32> to vector<8x128xf32>
    %c0_6 = arith.constant 0 : index
    %c0_7 = arith.constant 0 : index
    %c0_8 = arith.constant 0 : index
    %7 = vector.load %arg5[%c0_6, %c0_7, %c0_8] : memref<1x128x128xf32, #tpu.memory_space<vmem>>, vector<1x128x128xf32>
    %8 = vector.shape_cast %7 : vector<1x128x128xf32> to vector<128x128xf32>
    %cst = arith.constant dense<0.000000e+00> : vector<8x128xf32>
    %9 = tpu.matmul %6, %8, %cst {dimension_numbers = #tpu.dot_dimension_numbers<[1], [0], [0], [1], [0, 0, 1, 1], [], []>} : vector<8x128xf32>, vector<128x128xf32>, vector<8x128xf32> -> vector<8x128xf32>
    %10 = arith.addf %4, %9 : vector<8x128xf32>
    %c0_9 = arith.constant 0 : index
    %c0_10 = arith.constant 0 : index
    %c0_11 = arith.constant 0 : index
    %11 = vector.load %arg7[%c0_9, %c0_10, %c0_11] : memref<1x8x128xf32, #tpu.memory_space<vmem>>, vector<1x8x128xf32>
    %12 = vector.shape_cast %11 : vector<1x8x128xf32> to vector<8x128xf32>
    %13 = vector.shape_cast %10 : vector<8x128xf32> to vector<1x8x128xf32>
    tpu.vector_store %arg7[%c0_9, %c0_10, %c0_11], %13 {strides = array<i32>} : memref<1x8x128xf32, #tpu.memory_space<vmem>>, vector<1x8x128xf32>,
    return
  }
  func.func @transform_0(%arg0: i32, %arg1: i32, %arg2: i32, %arg3: i32) -> (i32, i32, i32) {
    %c0_i32 = arith.constant 0 : i32
    return %arg0, %arg1, %arg3 : i32, i32, i32
  }
  func.func @transform_1(%arg0: i32, %arg1: i32, %arg2: i32, %arg3: i32) -> (i32, i32, i32) {
    %c0_i32 = arith.constant 0 : i32
    return %arg0, %arg3, %arg2 : i32, i32, i32
  }
  func.func @transform_2(%arg0: i32, %arg1: i32, %arg2: i32, %arg3: i32) -> (i32, i32, i32) {
    %c0_i32 = arith.constant 0 : i32
    %c0_i32_0 = arith.constant 0 : i32
    return %arg0, %c0_i32, %arg2 : i32, i32, i32
  }
  func.func @transform_3(%arg0: i32, %arg1: i32, %arg2: i32, %arg3: i32) -> (i32, i32, i32) {
    %c0_i32 = arith.constant 0 : i32
    return %arg0, %arg1, %arg2 : i32, i32, i32
  }
}

</mosaic_0001>

<bundles_post_ra>
// kernel: tpu_custom_call.1
= control target key start
LH: loop header
LB: loop body
LE: loop exit
PB: predicated region body
PF: predicated region fallthrough
CT: control target
= control target key end

     0   :  { %s990_s0 = inlined_call_operand.hbm [shape: f32[2,8,128], index: 0, kind: input, shape index: {}]   ;;  %s991_s1 = inlined_call_operand.hbm [shape: f32[2,128,128], index: 1, kind: input, shape index: {}]   ;;  %s992_s2 = inlined_call_operand.hbm [shape: f32[2,1,128], index: 2, kind: input, shape index: {}]   ;;  %s993_s3 = inlined_call_operand.hbm [shape: f32[2,8,128], index: 3, kind: output, shape index: {}]  }
   0x1   :  { %996 = sst [smem:[#allocation15_spill]] %s991_s1 }
   0x2   :  { %8 = vsyncpa [#allocation3], 0 }
   0x3   :  { %10 = vsyncpa [#allocation3 + $0x1], 0 }
   0x4   :  { %11 = vsyncpa [#allocation6], 0 }
   0x5   :  { %13 = vsyncpa [#allocation6 + $0x1], 0 }
   0x6   :  { %14 = vsyncpa [#allocation4], 0 }
   0x7   :  { %16 = vsyncpa [#allocation4 + $0x1], 0  ;;  %s801_s12 = smov 0   ;;  %s803_s13 = smov 0  }
   0x8   :  { %s805_s14 = smov 0   ;;  %s807_s15 = smov 0  }
   0x9   :  { %s809_s16 = smov 0   ;;  %s811_s17 = smov 0  }
   0xa LB: > { %997 = sst [smem:[#allocation12_spill]] %s765_s14  ;;  %s832_s18 = sadd.s32 4294967295, %s777_s17   ;;  %s777_s17 = sphi %s811_s17, %s22_s17   ;;  %s773_s16 = sphi %s809_s16, %s1014_s16   ;;  %s769_s15 = sphi %s807_s15, %s1013_s15   ;;  %s765_s14 = sphi %s805_s14, %s1012_s14   ;;  %s761_s13 = sphi %s803_s13, %s1011_s13   ;;  %s757_s12 = sphi %s801_s12, %s1010_s12  }
   0xb   : > { %s509_s19 = sadd.s32 4294967294, %s777_s17   ;;  %s48_s20 = sadd.s32 1, %s773_s16 }
   0xc   : > { %s59_s21 = sadd.s32 1, %s765_s14  ;;  %p50_p0 = scmp.ge.s32.totalorder %s48_s20, 2 }
   0xd   : > { %p66_p1 = scmp.ne.s32.totalorder %s765_s14, %s761_s13  ;;  %p67_p2 = scmp.eq.s32.totalorder %s777_s17, 0 }
   0xe   : > { %p72_p3 = scmp.ne.s32.totalorder %s761_s13, %s757_s12  ;;  %s1016_s20 = smov (%p50_p0, %s48_s20), 0 }
   0xf   : > { %998 = sst [smem:[#allocation13_spill]] %s1016_s20  ;;  %p844_p4 = por %p67_p2, %p66_p1 }
  0x10   : > { %p73_p5 = scmp.eq.s32.totalorder %s832_s18, 0  ;;  %s52_s23 = ssub.s32 %s773_s16, %s1016_s20 }
  0x11   : > { %p158_p6 = scmp.eq.s32.totalorder %s832_s18, 1  ;;  %p57_p7 = scmp.eq.s32.totalorder %s52_s23, 0 }
  0x12   : > { %p852_p8 = por %p73_p5, %p72_p3  ;;  %p164_p10 = scmp.eq.s32.totalorder %s509_s19, 1 }
  0x13   : > { %p856_p9 = por %p158_p6, %p66_p1  ;;  %p511_p12 = scmp.ge.s32.totalorder %s777_s17, 2 }
  0x14   : > { %s861_s26 = scalar_select %p57_p7, %s765_s14, %s59_s21  }
  0x15   : > { %p863_p11 = por %p164_p10, %p72_p3  ;;  %p548_p13 = scmp.lt.s32.totalorder %s777_s17, 2 }
  0x16   : > { %1002 = sst [smem:[#allocation14_spill]] %s861_s26  ;;  %s870_s28 = sand.u32 1, %s765_s14  }
  0x17   : > { %s205_s29 = sand.u32 1, %s777_s17   ;;  %s514_s30 = sshll.u32 %s870_s28, 7 }
  0x18   : > { %p876_p0 = pnand %p548_p13, %p844_p4  ;;  %s525_s5 = sshll.u32 %s773_s16, 7 }
  0x19   : > { %s1005_s1 = sld [smem:[#allocation15_spill]]  ;;  %s209_s10 = scalar_lea.vmem [#allocation5], %s514_s30 }
  0x1a   : > { %s220_s11 = sshll.u32 %s209_s10, 4  ;;  %s206_s19 = scalar_lea.sflag [#allocation6], %s205_s29  ;;  %s221_s11 = int_to_ptr.vmem [resolvable:$true] %s220_s11 }
  0x1b   : > { %s779_s21 = smov 128   ;;  %s780_s22 = smov 8  }
  0x1c   : > { %p517_p1 = scmp.ge.s32.totalorder %s777_s17, 1  ;;  %p246_p2 = scmp.lt.s32.totalorder %s777_s17, 3 }
  0x1d   : > { %s513_s30 = sshll.u32 %s773_s16, 3  ;;  %s233_s26 = scalar_lea.vmem [#allocation7], %s870_s28 }
  0x1e   : > { %p888_p3 = pnand %p517_p1, %p246_p2  ;;  %s194_s29 = scalar_lea.hbm %s990_s0, %s513_s30 }
  0x1f   : > { %s217_s8 = scalar_lea.hbm %s1005_s1, %s525_s5  ;;  %s512_s5 = sshll.u32 %s870_s28, 3 }
  0x20   : > { %s218_s9 = sshll.u32 %s217_s8, 4  ;;  %s196_s8 = sshll.u32 %s194_s29, 4  ;;  %s219_s9 = int_to_ptr.hbm [resolvable:$true] %s218_s9  ;;  %s197_s8 = int_to_ptr.hbm [resolvable:$true] %s196_s8 }
  0x21   : > { %540 = dma.hbm_to_vmem [thread:$0]  (!%p876_p0), %s219_s9, 2048, %s221_s11, %s206_s19, %s779_s21, %s779_s21, %s780_s22  }
  0x22   : > { %s188_s10 = scalar_lea.vmem [#allocation2], %s512_s5  ;;  %s185_s9 = scalar_lea.sflag [#allocation3], %s870_s28 }
  0x23   : > { %s198_s1 = sshll.u32 %s188_s10, 4  ;;  %s237_s22 = scalar_lea.hbm %s992_s2, %s773_s16  ;;  %s199_s1 = int_to_ptr.vmem [resolvable:$true] %s198_s1 }
  0x24   : > { %537 = dma.hbm_to_vmem [thread:$0]  (!%p876_p0), %s197_s8, 128, %s199_s1, %s185_s9  }
  0x25   : > { %s239_s20 = sshll.u32 %s237_s22, 4  ;;  %s241_s14 = sshll.u32 %s233_s26, 4  ;;  %s240_s20 = int_to_ptr.hbm [resolvable:$true] %s239_s20  ;;  %s242_s14 = int_to_ptr.vmem [resolvable:$true] %s241_s14 }
  0x26   : > { %543 = dma.hbm_to_vmem [thread:$0]  (!%p876_p0), %s240_s20, 16, %s242_s14, %s206_s19  }
  0x27   : > { %250 = sbr.rel (%p888_p3) target bundleno = 211 (0xd3), region = 32  ;;  %s910_s5 = sand.u32 (!%p888_p3), 1, %s761_s13  }
  0x28   : > { %s518_s1 = sshll.u32 (!%p888_p3), %s910_s5, 3  ;;  %s253_s30 = scalar_lea.sflag (!%p888_p3), [#allocation3], %s910_s5 }
  0x29   : > { %s916_s6 = scalar_lea.vmem (!%p888_p3), [#allocation2], %s518_s1 }
  0x2c   : > { %744 = dma.done.wait (%p852_p8), %s253_s30, 128  }
  0x2d   : > { %746 = vsyncadd (%p852_p8), %s253_s30, 4294967168  ;;  %s262_s14 = sand.u32 1, %s832_s18   ;;  %s519_s20 = sshll.u32 %s910_s5, 7 }
  0x2e   : > { %s263_s26 = scalar_lea.sflag [#allocation6], %s262_s14  ;;  %s924_s28 = scalar_lea.vmem [#allocation5], %s519_s20 }
  0x2f   : > { %748 = dma.done.wait (%p852_p8), %s263_s26, 2064  }
  0x30   : > { %750 = vsyncadd (%p852_p8), %s263_s26, 4294965232  ;;  %v335_v0 = vld [vmem:[%s924_s28 + $0x78] sm:$0xff]  ;;  %v334_v1 = vld [vmem:[%s924_s28 + $0x70] sm:$0xff]  ;;  %s275_s18 = scalar_lea.vmem [#allocation7], %s910_s5  ;;  %s522_s24 = sshll.u32 %s769_s15, 3 }
  0x31   : > { %336 = vmatpush.msra.mxu0 %v335_v0  ;;  %v333_v2 = vld [vmem:[%s924_s28 + $0x68] sm:$0xff]  ;;  %v332_v3 = vld [vmem:[%s924_s28 + $0x60] sm:$0xff]  ;;  %v331_v4 = vld [vmem:[%s924_s28 + $0x58] sm:$0xff]  ;;  %s371_s23 = scalar_lea.hbm %s993_s3, %s522_s24  ;;  %s307_s7 = scalar_lea.vmem [#allocation8], %s518_s1 }
  0x32   : > { %v330_v5 = vld [vmem:[%s924_s28 + $0x50] sm:$0xff]  ;;  %v329_v6 = vld [vmem:[%s924_s28 + $0x48] sm:$0xff]  ;;  %v328_v7 = vld [vmem:[%s924_s28 + $0x40] sm:$0xff]  ;;  %s373_s29 = sshll.u32 %s307_s7, 4  ;;  %s375_s8 = sshll.u32 %s371_s23, 4  ;;  %s374_s29 = int_to_ptr.vmem [resolvable:$true] %s373_s29  ;;  %s376_s8 = int_to_ptr.hbm [resolvable:$true] %s375_s8 }
  0x33   : > { %337 = vmatpush.msra.mxu0 %v334_v1  ;;  %v327_v8 = vld [vmem:[%s924_s28 + $0x38] sm:$0xff]  ;;  %v326_v9 = vld [vmem:[%s924_s28 + $0x30] sm:$0xff]  ;;  %v325_v10 = vld [vmem:[%s924_s28 + $0x28] sm:$0xff]  ;;  %s359_s10 = scalar_lea.sflag [#allocation4], %s910_s5  ;;  %s705_s9 = sshra.s32 %s376_s8, 4  ;;  %s706_s9 = int_to_ptr.hbm [resolvable:$true] %s705_s9 }
  0x34   : > { %v324_v11 = vld [vmem:[%s924_s28 + $0x20] sm:$0xff]  ;;  %v323_v12 = vld [vmem:[%s924_s28 + $0x18] sm:$0xff]  ;;  %v322_v13 = vld [vmem:[%s924_s28 + $0x10] sm:$0xff]  ;;  %s707_s15 = scalar_lea.hbm %s706_s9, 8  ;;  %s711_s22 = scalar_lea.hbm %s993_s3, 16 }
  0x35   : > { %338 = vmatpush.msra.mxu0 %v333_v2  ;;  %v321_v14 = vld [vmem:[%s924_s28 + $0x8] sm:$0xff]  ;;  %v320_v15 = vld [vmem:[%s924_s28] sm:$0xff]  ;;  %v319_v16 = vld [vmem:[%s916_s6] sm:$0xff]  ;;  %p708_p4 = scmp.ne.s32.totalorder %s706_s9, %s707_s15  ;;  %p712_p7 = scmp.lt.s32.totalorder %s706_s9, %s993_s3 }
  0x36   : > { %v600_v17 = vld [vmem:[%s275_s18] ss:$0 sm:$0xff]  ;;  %p713_p8 = scmp.lt.s32.totalorder %s711_s22, %s707_s15 }
  0x37   : > { %339 = vmatpush.msra.mxu0 %v332_v3  ;;  %p709_p5 = pnand %p708_p4, %p856_p9 }
  0x38   : > { %p714_p10 = por %p713_p8, %p712_p7 }
  0x39   : > { %340 = vmatpush.msra.mxu0 %v331_v4  ;;  %p710_p6 = pneg %p709_p5 }
  0x3b   : > { %341 = vmatpush.msra.mxu0 %v330_v5  ;;  %p715_p13 = pnand %p714_p10, %p710_p6 }
  0x3d   : > { %342 = vmatpush.msra.mxu0 %v329_v6 }
  0x3f   : > { %343 = vmatpush.msra.mxu0 %v328_v7 }
  0x41   : > { %344 = vmatpush.msra.mxu0 %v327_v8 }
  0x43   : > { %345 = vmatpush.msra.mxu0 %v326_v9 }
  0x45   : > { %346 = vmatpush.msra.mxu0 %v325_v10 }
  0x47   : > { %347 = vmatpush.msra.mxu0 %v324_v11 }
  0x49   : > { %348 = vmatpush.msra.mxu0 %v323_v12 }
  0x4b   : > { %349 = vmatpush.msra.mxu0 %v322_v13 }
  0x4d   : > { %350 = vmatpush.msra.mxu0 %v321_v14 }
  0x4f   : > { %351 = vmatpush.msra.mxu0 %v320_v15 }
  0x50   : > { %352 = vmatmul.f32.vlgmr.msra.gmra.mxu0 %v319_v16 }
  0xcd   : > { %v353_v18 = vpop.f32.mrf.mxu0 }
  0xce   : > { %v356_v19 = vadd.f32 %v600_v17, %v353_v18 }
  0xd0   : > { %357 = vst [vmem:[%s307_s7] sm:$0xff] %v356_v19 }
  0xd1   : > { %718 = shalt.err (!%p715_p13)
}
  0xd2   : > { %532 = dma.vmem_to_hbm [thread:$0]  (%p856_p9), %s374_s29, 128, %s376_s8, %s359_s10  }
  0xd3 PF: > { %s387_s5 = sand.u32 1, %s757_s12   ;;  %p545_p0 = pnand %p511_p12, %p863_p11 }
  0xd4   : > { %s388_s6 = scalar_lea.sflag [#allocation4], %s387_s5 }
  0xd5   : > { %p546_p1 = pneg %p545_p0 }
  0xd7   : > { %752 = dma.done.wait (%p546_p1), %s388_s6, 128  }
  0xd8   : > { %754 = vsyncadd (%p546_p1), %s388_s6, 4294967168  ;;  %s22_s17 = sadd.s32 1, %s777_s17   ;;  %s1007_s14 = sld [smem:[#allocation12_spill]] }
  0xd9   : > { %p19_p2 = scmp.ge.s32.totalorder %s22_s17, 4   ;;  %s1008_s20 = sld [smem:[#allocation14_spill]] }
  0xda   : > { %s1009_s25 = sld [smem:[#allocation13_spill]]  ;;  %s1010_s12 = smov %s761_s13 }
  0xdb   : > { %s1013_s15 = smov %s773_s16 }
  0xdc   :  { %21 = sbr.rel (!%p19_p2) target bundleno = 10 (0xa), region = 105 }
  0xde   : > { %s1011_s13 = smov %s1007_s14 }
  0xdf   : > { %s1012_s14 = smov %s1008_s20 }
  0xe0   : > { %s1014_s16 = smov %s1009_s25 }
  0xe1   :  { %394 = vsyncpa [#allocation3], 1 }
  0xe2   :  { %396 = vsyncpa [#allocation3 + $0x1], 1 }
  0xe3   :  { %397 = vsyncpa [#allocation6], 1 }
  0xe4   :  { %399 = vsyncpa [#allocation6 + $0x1], 1 }
  0xe5   :  { %400 = vsyncpa [#allocation4], 1 }
  0xe6   :  { %402 = vsyncpa [#allocation4 + $0x1], 1 }

</bundles_post_ra>
